<compile_context>
chip_gen: v7x
topology: tpu7x:2x2x1
jax: 0.10.0
libtpu: 0.0.40
codegen_flags: <defaults>
</compile_context>

<pallas_src>
import functools

import jax
import jax.numpy as jnp
from jax import lax
from jax.experimental import pallas as pl
from jax.experimental.pallas import tpu as pltpu

_FEAT = 20
_LANE = 128
_NUM_CORES = 2   # v7x has 2 TensorCores; the extra parallel grid axis is harmless on v5e/v6e.


def _round_up(n, m):
    return (n + m - 1) // m * m


def _fixed_hidden_mlp_kernel(xt_ref, w1t_ref, wtt_ref, b1t_ref, bt_ref,
                             sum_ref, abs_ref, *,
                             n_valid, tile_b, num_chunks, steps_per_core,
                             first_mask_tile, total_tiles):
    j = pl.program_id(1)

    # Zero this core's resident (20, 128) accumulators at the start of its sweep.
    @pl.when(j == 0)
    def _():
        sum_ref[...] = jnp.zeros_like(sum_ref)
        abs_ref[...] = jnp.zeros_like(abs_ref)

    xt = xt_ref[...]                                             # (20, tile_b) f32
    # Fused linear -> (@rand_weight + 1) (weights pre-multiplied in wrapper), ReLU.
    h = jnp.maximum(
        jnp.dot(w1t_ref[...], xt, preferred_element_type=jnp.float32)
        + b1t_ref[...], 0.0)                                     # (20, tile_b)
    # The SAME Linear applied again (weight sharing).
    y = (jnp.dot(wtt_ref[...], h, preferred_element_type=jnp.float32)
         + bt_ref[...])                                          # (20, tile_b)

    def accumulate(vals):
        # Collapse the tile's lane (batch) axis down to 128 lanes with VALU adds
        # only; the final 128-lane / 20-row reduction happens in the wrapper.
        ps = vals[:, 0:_LANE]
        pa = jnp.abs(vals[:, 0:_LANE])
        for k in range(1, num_chunks):
            chunk = vals[:, k * _LANE:(k + 1) * _LANE]
            ps = ps + chunk
            pa = pa + jnp.abs(chunk)
        sum_ref[...] += ps
        abs_ref[...] += pa

    if first_mask_tile < total_tiles:
        # Static: batch padding exists.  Only the (at most two) boundary tiles
        # hold padded lanes; every other grid step takes the mask-free path.
        gidx = pl.program_id(0) * steps_per_core + j
        needs_mask = gidx >= first_mask_tile

        @pl.when(jnp.logical_not(needs_mask))
        def _():
            accumulate(y)

        @pl.when(needs_mask)
        def _():
            col = gidx * tile_b + lax.broadcasted_iota(jnp.int32, y.shape, 1)
            accumulate(jnp.where(col < n_valid, y, 0.0))
    else:
        accumulate(y)


def fixed_hidden_mlp(x, wt, b, rw, *, max_tile_b=8192):
    """FixedHiddenMLP forward. wt is (in=20, out=20) == torch W.T; b is (1, 20)."""
    batch, feat = x.shape
    assert feat == _FEAT and wt.shape == (_FEAT, _FEAT)
    assert rw.shape == (_FEAT, _FEAT) and b.shape == (1, _FEAT)

    max_tile_b = max(_LANE, (max_tile_b // _LANE) * _LANE)
    tile_b = min(max_tile_b, _round_up(batch, _LANE))            # lane-aligned batch tile
    padded = _round_up(batch, _NUM_CORES * tile_b)
    steps_per_core = padded // (_NUM_CORES * tile_b)
    total_tiles = padded // tile_b
    first_mask_tile = batch // tile_b                            # first tile with padded lanes
    num_chunks = tile_b // _LANE

    x = x.astype(jnp.float32)
    if padded != batch:
        x = jnp.pad(x, ((0, padded - batch), (0, 0)))
    xt = x.T                                                     # (20, padded): batch on lanes

    # Algebraic fusion of the first two layers (done once, outside the kernel):
    #   h = relu(x @ (wt @ rw) + (b @ rw + 1))
    wtt = wt.T.astype(jnp.float32)                               # (20, 20)
    w1t = rw.T.astype(jnp.float32) @ wtt                         # == (wt @ rw).T
    b1t = (b.astype(jnp.float32) @ rw.astype(jnp.float32) + 1.0).T   # (20, 1)
    bt = b.astype(jnp.float32).T                                 # (20, 1)

    kernel = functools.partial(
        _fixed_hidden_mlp_kernel, n_valid=batch, tile_b=tile_b,
        num_chunks=num_chunks, steps_per_core=steps_per_core,
        first_mask_tile=first_mask_tile, total_tiles=total_tiles)

    col_sum, col_abs = pl.pallas_call(
        kernel,
        out_shape=(jax.ShapeDtypeStruct((_NUM_CORES, _FEAT, _LANE), jnp.float32),
                   jax.ShapeDtypeStruct((_NUM_CORES, _FEAT, _LANE), jnp.float32)),
        grid_spec=pltpu.PrefetchScalarGridSpec(
            num_scalar_prefetch=0,
            grid=(_NUM_CORES, steps_per_core),
            in_specs=[
                # x^T tiled over the batch (lane) axis; each core owns a
                # contiguous range of batch tiles.
                pl.BlockSpec((_FEAT, tile_b),
                             lambda c, j: (0, c * steps_per_core + j)),
                pl.BlockSpec((_FEAT, _FEAT), lambda c, j: (0, 0)),  # (wt @ rw)^T resident
                pl.BlockSpec((_FEAT, _FEAT), lambda c, j: (0, 0)),  # wt^T resident
                pl.BlockSpec((_FEAT, 1), lambda c, j: (0, 0)),      # (b @ rw + 1)^T
                pl.BlockSpec((_FEAT, 1), lambda c, j: (0, 0)),      # b^T
            ],
            out_specs=[
                pl.BlockSpec((None, _FEAT, _LANE), lambda c, j: (c, 0, 0)),
                pl.BlockSpec((None, _FEAT, _LANE), lambda c, j: (c, 0, 0)),
            ],
        ),
        compiler_params=pltpu.CompilerParams(
            # Core axis is "parallel" (v7x megacore); the batch-tile axis is a
            # reduction (accumulators revisited) so it must stay "arbitrary".
            dimension_semantics=("parallel", "arbitrary")),
    )(xt, w1t, wtt, b1t, bt)

    s = jnp.sum(col_sum)
    s_abs = jnp.sum(col_abs)
    # while x.abs().sum() > 1: x /= 2 ; return x.sum()
    # Halving by 2 is exact in fp32, so halving the two precomputed sums is
    # equivalent to halving x and re-reducing each iteration.
    s, _ = lax.while_loop(lambda c: c[1] > 1.0,
                          lambda c: (c[0] * 0.5, c[1] * 0.5),
                          (s, s_abs))
    return s


def _reference(x, wt, b, rw):
    # Pure-JAX reference with the literal module semantics (array while-loop).
    h = x @ wt + b
    h = jnp.maximum(h @ rw + 1.0, 0.0)
    y = h @ wt + b
    y = lax.while_loop(lambda v: jnp.sum(jnp.abs(v)) > 1.0, lambda v: v * 0.5, y)
    return jnp.sum(y)


if __name__ == "__main__":
    key = jax.random.PRNGKey(0)
    kx, kw, kb, kr, kx2 = jax.random.split(key, 5)

    # nn.Linear(20, 20) default init U(-1/sqrt(in), 1/sqrt(in)); weight stored
    # as (in, out) == torch W.T, bias stored as (1, out).
    bound = 1.0 / jnp.sqrt(jnp.float32(_FEAT))
    wt = jax.random.uniform(kw, (_FEAT, _FEAT), jnp.float32, -bound, bound)
    b = jax.random.uniform(kb, (1, _FEAT), jnp.float32, -bound, bound)
    # constant, non-trainable random weight ~ U[0, 1)
    rw = jax.random.uniform(kr, (_FEAT, _FEAT), jnp.float32)

    # Case 1: the module's own example shape (batch=2).
    x = jax.random.uniform(kx, (2, _FEAT), jnp.float32)
    out = jax.block_until_ready(fixed_hidden_mlp(x, wt, b, rw))
    ref = _reference(x, wt, b, rw)
    assert out.shape == ()
    assert jnp.allclose(out, ref, atol=1e-4, rtol=1e-4), (out, ref)

    # Case 2: non-aligned batch, small tiles -> multi-step accumulation per core,
    # plus both the masked and unmasked accumulation paths.
    x2 = jax.random.uniform(kx2, (517, _FEAT), jnp.float32)
    out2 = jax.block_until_ready(fixed_hidden_mlp(x2, wt, b, rw, max_tile_b=128))
    ref2 = _reference(x2, wt, b, rw)
    assert jnp.allclose(out2, ref2, atol=1e-4, rtol=1e-4), (out2, ref2)

    # Case 3: same batch with the default (large) tile -> multi-chunk lane
    # accumulation inside a single grid step per core.
    out3 = jax.block_until_ready(fixed_hidden_mlp(x2, wt, b, rw))
    assert jnp.allclose(out3, ref2, atol=1e-4, rtol=1e-4), (out3, ref2)

    print("KERNEL_OK")
</pallas_src>

<mosaic_0001>
module attributes {stable_mosaic.version = 11 : i64} {
  func.func @_fixed_hidden_mlp_kernel(%arg0: i32, %arg1: i32, %arg2: memref<20x128xf32, #tpu.memory_space<vmem>>, %arg3: memref<20x20xf32, #tpu.memory_space<vmem>>, %arg4: memref<20x20xf32, #tpu.memory_space<vmem>>, %arg5: memref<20x1xf32, #tpu.memory_space<vmem>>, %arg6: memref<20x1xf32, #tpu.memory_space<vmem>>, %arg7: memref<1x20x128xf32, #tpu.memory_space<vmem>>, %arg8: memref<1x20x128xf32, #tpu.memory_space<vmem>>) attributes {dimension_semantics = [#tpu.dimension_semantics<parallel>, #tpu.dimension_semantics<arbitrary>], iteration_bounds = array<i64: 2, 1>, scalar_prefetch = 0 : i64, scratch_operands = 0 : i64, tpu.core_type = #tpu.core_type<tc>, window_params = [{transform_indices = @transform_0, window_bounds = array<i64: 20, 128>}, {pipeline_mode = #tpu.pipeline_mode<synchronous>, transform_indices = @transform_1, window_bounds = array<i64: 20, 20>}, {pipeline_mode = #tpu.pipeline_mode<synchronous>, transform_indices = @transform_2, window_bounds = array<i64: 20, 20>}, {pipeline_mode = #tpu.pipeline_mode<synchronous>, transform_indices = @transform_3, window_bounds = array<i64: 20, 1>}, {pipeline_mode = #tpu.pipeline_mode<synchronous>, transform_indices = @transform_4, window_bounds = array<i64: 20, 1>}, {transform_indices = @transform_5, window_bounds = array<i64: 1, 20, 128>}, {transform_indices = @transform_6, window_bounds = array<i64: 1, 20, 128>}]} {
    %c0_i32 = arith.constant 0 : i32
    %0 = arith.cmpi eq, %arg1, %c0_i32 : i32
    %1 = arith.extui %0 : i1 to i32
    %c0_i32_0 = arith.constant 0 : i32
    %2 = arith.cmpi ne, %1, %c0_i32_0 : i32
    scf.if %2 {
      %cst_15 = arith.constant 0.000000e+00 : f32
      %24 = vector.broadcast %cst_15 : f32 to vector<20x128xf32>
      %c0_16 = arith.constant 0 : index
      %c0_17 = arith.constant 0 : index
      %c0_18 = arith.constant 0 : index
      %25 = vector.load %arg7[%c0_16, %c0_17, %c0_18] : memref<1x20x128xf32, #tpu.memory_space<vmem>>, vector<1x20x128xf32>
      %26 = vector.shape_cast %25 : vector<1x20x128xf32> to vector<20x128xf32>
      %27 = vector.shape_cast %24 : vector<20x128xf32> to vector<1x20x128xf32>
      tpu.vector_store %arg7[%c0_16, %c0_17, %c0_18], %27 {strides = array<i32>} : memref<1x20x128xf32, #tpu.memory_space<vmem>>, vector<1x20x128xf32>,
      %cst_19 = arith.constant 0.000000e+00 : f32
      %28 = vector.broadcast %cst_19 : f32 to vector<20x128xf32>
      %c0_20 = arith.constant 0 : index
      %c0_21 = arith.constant 0 : index
      %c0_22 = arith.constant 0 : index
      %29 = vector.load %arg8[%c0_20, %c0_21, %c0_22] : memref<1x20x128xf32, #tpu.memory_space<vmem>>, vector<1x20x128xf32>
      %30 = vector.shape_cast %29 : vector<1x20x128xf32> to vector<20x128xf32>
      %31 = vector.shape_cast %28 : vector<20x128xf32> to vector<1x20x128xf32>
      tpu.vector_store %arg8[%c0_20, %c0_21, %c0_22], %31 {strides = array<i32>} : memref<1x20x128xf32, #tpu.memory_space<vmem>>, vector<1x20x128xf32>,
    } else {
    }
    %c0 = arith.constant 0 : index
    %c0_1 = arith.constant 0 : index
    %3 = vector.load %arg2[%c0, %c0_1] : memref<20x128xf32, #tpu.memory_space<vmem>>, vector<20x128xf32>
    %c0_2 = arith.constant 0 : index
    %c0_3 = arith.constant 0 : index
    %4 = vector.load %arg3[%c0_2, %c0_3] : memref<20x20xf32, #tpu.memory_space<vmem>>, vector<20x20xf32>
    %cst = arith.constant dense<0.000000e+00> : vector<20x128xf32>
    %5 = tpu.matmul %4, %3, %cst {dimension_numbers = #tpu.dot_dimension_numbers<[1], [0], [0], [1], [0, 0, 1, 1], [], []>} : vector<20x20xf32>, vector<20x128xf32>, vector<20x128xf32> -> vector<20x128xf32>
    %c0_4 = arith.constant 0 : index
    %c0_5 = arith.constant 0 : index
    %6 = vector.load %arg5[%c0_4, %c0_5] : memref<20x1xf32, #tpu.memory_space<vmem>>, vector<20x1xf32>
    %7 = vector.broadcast %6 : vector<20x1xf32> to vector<20x128xf32>
    %8 = arith.addf %5, %7 : vector<20x128xf32>
    %cst_6 = arith.constant 0.000000e+00 : f32
    %9 = vector.broadcast %cst_6 : f32 to vector<20x128xf32>
    %10 = arith.maximumf %8, %9 : vector<20x128xf32>
    %c0_7 = arith.constant 0 : index
    %c0_8 = arith.constant 0 : index
    %11 = vector.load %arg4[%c0_7, %c0_8] : memref<20x20xf32, #tpu.memory_space<vmem>>, vector<20x20xf32>
    %cst_9 = arith.constant dense<0.000000e+00> : vector<20x128xf32>
    %12 = tpu.matmul %11, %10, %cst_9 {dimension_numbers = #tpu.dot_dimension_numbers<[1], [0], [0], [1], [0, 0, 1, 1], [], []>} : vector<20x20xf32>, vector<20x128xf32>, vector<20x128xf32> -> vector<20x128xf32>
    %c0_10 = arith.constant 0 : index
    %c0_11 = arith.constant 0 : index
    %13 = vector.load %arg6[%c0_10, %c0_11] : memref<20x1xf32, #tpu.memory_space<vmem>>, vector<20x1xf32>
    %14 = vector.broadcast %13 : vector<20x1xf32> to vector<20x128xf32>
    %15 = arith.addf %12, %14 : vector<20x128xf32>
    %c1_i32 = arith.constant 1 : i32
    %16 = arith.muli %arg0, %c1_i32 : i32
    %17 = arith.addi %16, %arg1 : i32
    %c0_i32_12 = arith.constant 0 : i32
    %18 = arith.cmpi sge, %17, %c0_i32_12 : i32
    %true = arith.constant true
    %19 = arith.xori %18, %true : i1
    %20 = arith.extui %19 : i1 to i32
    %c0_i32_13 = arith.constant 0 : i32
    %21 = arith.cmpi ne, %20, %c0_i32_13 : i32
    scf.if %21 {
      %24 = math.absf %15 : vector<20x128xf32>
      %c0_15 = arith.constant 0 : index
      %c0_16 = arith.constant 0 : index
      %c0_17 = arith.constant 0 : index
      %25 = vector.load %arg7[%c0_15, %c0_16, %c0_17] : memref<1x20x128xf32, #tpu.memory_space<vmem>>, vector<1x20x128xf32>
      %26 = vector.shape_cast %25 : vector<1x20x128xf32> to vector<20x128xf32>
      %27 = arith.addf %26, %15 : vector<20x128xf32>
      %c0_18 = arith.constant 0 : index
      %c0_19 = arith.constant 0 : index
      %c0_20 = arith.constant 0 : index
      %28 = vector.load %arg7[%c0_18, %c0_19, %c0_20] : memref<1x20x128xf32, #tpu.memory_space<vmem>>, vector<1x20x128xf32>
      %29 = vector.shape_cast %28 : vector<1x20x128xf32> to vector<20x128xf32>
      %30 = vector.shape_cast %27 : vector<20x128xf32> to vector<1x20x128xf32>
      tpu.vector_store %arg7[%c0_18, %c0_19, %c0_20], %30 {strides = array<i32>} : memref<1x20x128xf32, #tpu.memory_space<vmem>>, vector<1x20x128xf32>,
      %c0_21 = arith.constant 0 : index
      %c0_22 = arith.constant 0 : index
      %c0_23 = arith.constant 0 : index
      %31 = vector.load %arg8[%c0_21, %c0_22, %c0_23] : memref<1x20x128xf32, #tpu.memory_space<vmem>>, vector<1x20x128xf32>
      %32 = vector.shape_cast %31 : vector<1x20x128xf32> to vector<20x128xf32>
      %33 = arith.addf %32, %24 : vector<20x128xf32>
      %c0_24 = arith.constant 0 : index
      %c0_25 = arith.constant 0 : index
      %c0_26 = arith.constant 0 : index
      %34 = vector.load %arg8[%c0_24, %c0_25, %c0_26] : memref<1x20x128xf32, #tpu.memory_space<vmem>>, vector<1x20x128xf32>
      %35 = vector.shape_cast %34 : vector<1x20x128xf32> to vector<20x128xf32>
      %36 = vector.shape_cast %33 : vector<20x128xf32> to vector<1x20x128xf32>
      tpu.vector_store %arg8[%c0_24, %c0_25, %c0_26], %36 {strides = array<i32>} : memref<1x20x128xf32, #tpu.memory_space<vmem>>, vector<1x20x128xf32>,
    } else {
    }
    %22 = arith.extui %18 : i1 to i32
    %c0_i32_14 = arith.constant 0 : i32
    %23 = arith.cmpi ne, %22, %c0_i32_14 : i32
    scf.if %23 {
      %c128_i32 = arith.constant 128 : i32
      %24 = arith.muli %17, %c128_i32 : i32
      %25 = tpu.iota {dimensions = array<i32: 1>} : vector<20x128xi32>
      %26 = vector.broadcast %24 : i32 to vector<20x128xi32>
      %27 = arith.addi %26, %25 : vector<20x128xi32>
      %c2_i32 = arith.constant 2 : i32
      %28 = vector.broadcast %c2_i32 : i32 to vector<20x128xi32>
      %29 = arith.cmpi slt, %27, %28 : vector<20x128xi32>
      %cst_15 = arith.constant 0.000000e+00 : f32
      %30 = vector.broadcast %cst_15 : f32 to vector<20x128xf32>
      %31 = arith.select %29, %15, %30 : vector<20x128xi1>, vector<20x128xf32>
      %32 = math.absf %31 : vector<20x128xf32>
      %c0_16 = arith.constant 0 : index
      %c0_17 = arith.constant 0 : index
      %c0_18 = arith.constant 0 : index
      %33 = vector.load %arg7[%c0_16, %c0_17, %c0_18] : memref<1x20x128xf32, #tpu.memory_space<vmem>>, vector<1x20x128xf32>
      %34 = vector.shape_cast %33 : vector<1x20x128xf32> to vector<20x128xf32>
      %35 = arith.addf %34, %31 : vector<20x128xf32>
      %c0_19 = arith.constant 0 : index
      %c0_20 = arith.constant 0 : index
      %c0_21 = arith.constant 0 : index
      %36 = vector.load %arg7[%c0_19, %c0_20, %c0_21] : memref<1x20x128xf32, #tpu.memory_space<vmem>>, vector<1x20x128xf32>
      %37 = vector.shape_cast %36 : vector<1x20x128xf32> to vector<20x128xf32>
      %38 = vector.shape_cast %35 : vector<20x128xf32> to vector<1x20x128xf32>
      tpu.vector_store %arg7[%c0_19, %c0_20, %c0_21], %38 {strides = array<i32>} : memref<1x20x128xf32, #tpu.memory_space<vmem>>, vector<1x20x128xf32>,
      %c0_22 = arith.constant 0 : index
      %c0_23 = arith.constant 0 : index
      %c0_24 = arith.constant 0 : index
      %39 = vector.load %arg8[%c0_22, %c0_23, %c0_24] : memref<1x20x128xf32, #tpu.memory_space<vmem>>, vector<1x20x128xf32>
      %40 = vector.shape_cast %39 : vector<1x20x128xf32> to vector<20x128xf32>
      %41 = arith.addf %40, %32 : vector<20x128xf32>
      %c0_25 = arith.constant 0 : index
      %c0_26 = arith.constant 0 : index
      %c0_27 = arith.constant 0 : index
      %42 = vector.load %arg8[%c0_25, %c0_26, %c0_27] : memref<1x20x128xf32, #tpu.memory_space<vmem>>, vector<1x20x128xf32>
      %43 = vector.shape_cast %42 : vector<1x20x128xf32> to vector<20x128xf32>
      %44 = vector.shape_cast %41 : vector<20x128xf32> to vector<1x20x128xf32>
      tpu.vector_store %arg8[%c0_25, %c0_26, %c0_27], %44 {strides = array<i32>} : memref<1x20x128xf32, #tpu.memory_space<vmem>>, vector<1x20x128xf32>,
    } else {
    }
    return
  }
  func.func @transform_0(%arg0: i32, %arg1: i32) -> (i32, i32) {
    %c1_i32 = arith.constant 1 : i32
    %0 = arith.muli %arg0, %c1_i32 : i32
    %1 = arith.addi %0, %arg1 : i32
    %c0_i32 = arith.constant 0 : i32
    %c0_i32_0 = arith.constant 0 : i32
    return %c0_i32, %1 : i32, i32
  }
  func.func @transform_1(%arg0: i32, %arg1: i32) -> (i32, i32) {
    %c0_i32 = arith.constant 0 : i32
    %c0_i32_0 = arith.constant 0 : i32
    %c0_i32_1 = arith.constant 0 : i32
    return %c0_i32, %c0_i32_0 : i32, i32
  }
  func.func @transform_2(%arg0: i32, %arg1: i32) -> (i32, i32) {
    %c0_i32 = arith.constant 0 : i32
    %c0_i32_0 = arith.constant 0 : i32
    %c0_i32_1 = arith.constant 0 : i32
    return %c0_i32, %c0_i32_0 : i32, i32
  }
  func.func @transform_3(%arg0: i32, %arg1: i32) -> (i32, i32) {
    %c0_i32 = arith.constant 0 : i32
    %c0_i32_0 = arith.constant 0 : i32
    %c0_i32_1 = arith.constant 0 : i32
    return %c0_i32, %c0_i32_0 : i32, i32
  }
  func.func @transform_4(%arg0: i32, %arg1: i32) -> (i32, i32) {
    %c0_i32 = arith.constant 0 : i32
    %c0_i32_0 = arith.constant 0 : i32
    %c0_i32_1 = arith.constant 0 : i32
    return %c0_i32, %c0_i32_0 : i32, i32
  }
  func.func @transform_5(%arg0: i32, %arg1: i32) -> (i32, i32, i32) {
    %c0_i32 = arith.constant 0 : i32
    %c0_i32_0 = arith.constant 0 : i32
    %c0_i32_1 = arith.constant 0 : i32
    return %arg0, %c0_i32, %c0_i32_0 : i32, i32, i32
  }
  func.func @transform_6(%arg0: i32, %arg1: i32) -> (i32, i32, i32) {
    %c0_i32 = arith.constant 0 : i32
    %c0_i32_0 = arith.constant 0 : i32
    %c0_i32_1 = arith.constant 0 : i32
    return %arg0, %c0_i32, %c0_i32_0 : i32, i32, i32
  }
}

</mosaic_0001>

<bundles_post_ra>
// kernel: tpu_custom_call.1
= control target key start
LH: loop header
LB: loop body
LE: loop exit
PB: predicated region body
PF: predicated region fallthrough
CT: control target
= control target key end

     0   :  { %12 = vsyncpa [#allocation4], 0  ;;  %s1307_s0 = inlined_call_operand.vmem [shape: f32[20,256], index: 0, kind: input, shape index: {}]   ;;  %s1308_s1 = inlined_call_operand.hbm [shape: f32[20,20], index: 1, kind: input, shape index: {}]   ;;  %s1309_s2 = inlined_call_operand.hbm [shape: f32[20,20], index: 2, kind: input, shape index: {}]   ;;  %s1310_s3 = inlined_call_operand.vmem [shape: f32[20,1], index: 3, kind: input, shape index: {}]   ;;  %s1311_s4 = inlined_call_operand.vmem [shape: f32[20,1], index: 4, kind: input, shape index: {}]   ;;  %s1312_s5 = inlined_call_operand.vmem [shape: f32[2,20,128], index: 5, kind: output, shape index: {0}]   ;;  %s1313_s6 = inlined_call_operand.vmem [shape: f32[2,20,128], index: 6, kind: output, shape index: {1}]  }
   0x1   :  { %13 = vsyncpa [#allocation6], 0  ;;  %s1075_s21 = smov 0   ;;  %s1077_s22 = smov 0  }
   0x2   :  { %s1079_s23 = smov 0   ;;  %s1081_s24 = smov 0  }
   0x3   :  { %s1083_s25 = smov 0  }
   0x4 LB: > { %s783_s26 = sadd.s32 4294967295, %s1030_s25   ;;  %s31_s27 = sadd.s32 1, %s1026_s24  ;;  %s1030_s25 = sphi %s1083_s25, %s19_s25   ;;  %s1026_s24 = sphi %s1081_s24, %s1327_s24   ;;  %s1022_s23 = sphi %s1079_s23, %s1326_s23   ;;  %s1018_s22 = sphi %s1077_s22, %s1325_s22   ;;  %s1014_s21 = sphi %s1075_s21, %s1324_s21  }
   0x5   : > { %p33_p0 = scmp.ge.s32.totalorder %s31_s27, 2  ;;  %s40_s28 = sadd.s32 1, %s1018_s22 }
   0x6   : > { %p47_p1 = scmp.ne.s32.totalorder %s1018_s22, %s1014_s21  ;;  %p48_p2 = scmp.eq.s32.totalorder %s1030_s25, 0 }
   0x7   : > { %s1329_s27 = smov (%p33_p0, %s31_s27), 0  ;;  %p785_p4 = scmp.ge.s32.totalorder %s1030_s25, 1 }
   0x8   : > { %p1108_p3 = por %p48_p2, %p47_p1  ;;  %s37_s30 = ssub.s32 %s1026_s24, %s1329_s27 }
   0x9   : > { %p200_p5 = scmp.lt.s32.totalorder %s1030_s25, 3  ;;  %p38_p6 = scmp.eq.s32.totalorder %s37_s30, 0 }
   0xa   : > { %s1317_s29 = scalar_select %p1108_p3, 1, 0 }
   0xb   : > { %p1116_p7 = pnand %p785_p4, %p200_p5  ;;  %p1120_p8 = scmp.eq.s32.totalorder %s783_s26, 0 }
   0xc   : > { %s1125_s9 = scalar_select %p38_p6, %s1018_s22, %s40_s28  }
   0xd   : > { %s1318_s7 = scalar_select %p1116_p7, 1, 0 }
   0xe   : > { %s1319_s8 = scalar_select %p1120_p8, 1, 0 }
   0xf   : > { %p867_p9 = pneg %p1116_p7  ;;  %s1032_s10 = smov [#allocation3]  }
  0x10   : > { %s212_s11 = sshll.u32 %s1032_s10, 4  ;;  %s1033_s13 = smov [#allocation5]   ;;  %s213_s11 = int_to_ptr.vmem [resolvable:$true] %s212_s11 }
  0x11   : > { %p1131_p10 = pnand %p1120_p8, %p867_p9  ;;  %s225_s14 = sshll.u32 %s1033_s13, 4  ;;  %s226_s14 = int_to_ptr.vmem [resolvable:$true] %s225_s14 }
  0x12   : > { %s928_s17 = scalar_lea.hbm %s1308_s1, 384 }
  0x13   : > { %p929_p11 = scmp.ne.s32.totalorder %s1308_s1, %s928_s17  ;;  %p930_p12 = pneg %p1131_p10 }
  0x14   : > { %p935_p1 = scmp.lt.u32.totalorder %s928_s17, %s1308_s1 }
  0x15   : > { %p931_p13 = pnand %p930_p12, %p929_p11 }
  0x17   : > { %p932_p0 = pneg %p931_p13 }
  0x19   : > { %p937_p2 = pnand %p935_p1, %p932_p0 }
  0x1b   : > { %940 = shalt.err (!%p937_p2)
}
  0x1c   : > { %s941_s28 = scalar_lea.vmem %s213_s11, 384  ;;  %p949_p9 = scmp.lt.s32.totalorder %s213_s11, %s213_s11 }
  0x1d   : > { %p942_p4 = scmp.ne.s32.totalorder %s213_s11, %s941_s28  ;;  %p950_p8 = scmp.lt.s32.totalorder %s941_s28, %s941_s28 }
  0x1f   : > { %p944_p5 = pnand %p942_p4, %p930_p12  ;;  %p951_p7 = por %p950_p8, %p949_p9 }
  0x21   : > { %p945_p6 = pneg %p944_p5 }
  0x23   : > { %p952_p3 = pnand %p951_p7, %p945_p6 }
  0x25   : > { %955 = shalt.err (!%p952_p3)
}
  0x26   : > { %s1034_s30 = smov 128   ;;  %s1035_s10 = smov 8  }
  0x27   : > { %870 = dma.hbm_to_vmem [thread:$0]  (!%p1131_p10), %s1308_s1, 384, %s213_s11, [#allocation4], %s1034_s30, %s1034_s30, %s1035_s10  }
  0x28   : > { %s956_s18 = scalar_lea.hbm %s1309_s2, 384 }
  0x29   : > { %p957_p8 = scmp.ne.s32.totalorder %s1309_s2, %s956_s18  ;;  %p963_p11 = scmp.lt.u32.totalorder %s956_s18, %s1309_s2 }
  0x2b   : > { %p959_p3 = pnand %p957_p8, %p930_p12 }
  0x2d   : > { %p960_p7 = pneg %p959_p3 }
  0x2f   : > { %p965_p13 = pnand %p963_p11, %p960_p7 }
  0x31   : > { %968 = shalt.err (!%p965_p13)
}
  0x32   : > { %s969_s11 = scalar_lea.vmem %s226_s14, 384  ;;  %p977_p4 = scmp.lt.s32.totalorder %s226_s14, %s226_s14 }
  0x33   : > { %p970_p0 = scmp.ne.s32.totalorder %s226_s14, %s969_s11  ;;  %p978_p5 = scmp.lt.s32.totalorder %s969_s11, %s969_s11 }
  0x35   : > { %p972_p1 = pnand %p970_p0, %p930_p12  ;;  %p979_p6 = por %p978_p5, %p977_p4 }
  0x37   : > { %p973_p2 = pneg %p972_p1 }
  0x39   : > { %p980_p9 = pnand %p979_p6, %p973_p2 }
  0x3b   : > { %983 = shalt.err (!%p980_p9)
}
  0x3c   : > { %873 = dma.hbm_to_vmem [thread:$0]  (!%p1131_p10), %s1309_s2, 384, %s226_s14, [#allocation6], %s1034_s30, %s1034_s30, %s1035_s10  }
  0x3d   : > { %p788_p8 = scmp.ge.s32.totalorder %s1030_s25, 2 }
  0x3e   : > { %p1321_p3 = scmp.ne.s32.totalorder (!%p788_p8), %s1317_s29, 0 }
  0x3f   : > { %241 = sbr.rel (%p788_p8) target bundleno = 77 (0x4d), region = 32 }
  0x46   : > { %244 = sbr.rel (!%p1321_p3) target bundleno = 77 (0x4d), region = 36  ;;  %s246_s16 = sand.u32 (%p1321_p3), 1, %s1018_s22  }
  0x47   : > { %s789_s17 = sshll.u32 (%p1321_p3), %s1026_s24, 3  ;;  %s856_s18 = smul.u32 (%p1321_p3), 24, %s246_s16 }
  0x48   : > { %s251_s26 = scalar_lea.vmem (%p1321_p3), %s1307_s0, %s789_s17 }
  0x49   : > { %v283_v0 = vld [vmem:[%s251_s26] sm:$0xff] (%p1321_p3)  ;;  %v285_v1 = vld [vmem:[%s251_s26 + $0x10] sm:$0xff] (%p1321_p3)  ;;  %s248_s12 = scalar_lea.vmem (%p1321_p3), [#allocation2], %s856_s18 }
  0x4a   : > { %v287_v2 = vld [vmem:[%s251_s26 + $0x20] sm:$0xff] (%p1321_p3)  ;;  %284 = vst [vmem:[%s248_s12] sm:$0xff] (%p1321_p3), %v283_v0  ;;  %286 = vst [vmem:[%s248_s12 + $0x8] sm:$0xff] (%p1321_p3), %v285_v1 }
  0x4b   : > { %288 = vst [vmem:[%s248_s12 + $0x10] sm:$0xff] (%p1321_p3), %v287_v2 }
  0x4d PF: > { %p1322_p10 = scmp.ne.s32.totalorder %s1318_s7, 0 }
  0x4e   : > { %s300_s29 = sand.u32 (!%p1322_p10), 1, %s1014_s21   ;;  %p1323_p12 = scmp.ne.s32.totalorder (!%p1322_p10), %s1319_s8, 0 }
  0x4f   : > { %297 = sbr.rel (%p1322_p10) target bundleno = 567 (0x237), region = 74 }
  0x50   : > { %s857_s14 = smul.u32 (!%p1322_p10), 24, %s300_s29 }
  0x52   : > { %s1188_s30 = scalar_lea.vmem (!%p1322_p10), [#allocation2], %s857_s14 }
  0x56   : > { %1005 = dma.done.wait (%p1323_p12), [#allocation4], 384  }
  0x57   : > { %1007 = vsyncadd (%p1323_p12), [#allocation4], 4294966912 }
  0x58   : > { %1009 = dma.done.wait (%p1323_p12), [#allocation6], 384  }
  0x59   : > { %1011 = vsyncadd (%p1323_p12), [#allocation6], 4294966912  ;;  %p343_p7 = scmp.lt.s32.totalorder %s1022_s23, 1  ;;  %v1036_v3 = vmov 0.0|0.0   ;;  %vm1037_vm0 = vmmov 0   ;;  %v1038_v4 = vmov 0.0  }
  0x5a   : > { %850 = vmatprep.subr.bf16.mxu0 %v1036_v3  ;;  %853 = vmatprep.subr.bf16.mxu1 %v1036_v3  ;;  %v1039_v5 = vmov 0   ;;  %v363_v6 = vld [vmem:[%s1188_s30] sm:$0xff]  ;;  %v364_v7 = vld [vmem:[%s1188_s30 + $0x8] sm:$0xff]  ;;  %v371_v10 = vld [vmem:[%s1310_s3 + $0x10] sm:$0xf]  ;;  %vm397_vm1 = vcmask 1043456  }
  0x5b   : > { %s344_s21 = scalar_select %p343_p7, %s1022_s23, 1  ;;  %826 = vmatprep.mubr.msk.f32.mxu0 %vm1037_vm0, %v1038_v4  ;;  %926 = vset.pattern.permute.xlu0 %v1039_v5  ;;  %v851_v8 = vpack.c.bf16 %v364_v7, %v363_v6  ;;  %v369_v9 = vld [vmem:[%s1310_s3] sm:$0xff]  ;;  %v365_v11 = vld [vmem:[%s1188_s30 + $0x10] sm:$0xf]  ;;  %vm387_vm2 = vcmask 162816   ;;  %v367_v16 = vld [vmem:[#allocation3 + $0x8] sm:$0xff] }
  0x5c   : > { %927 = vset.pattern.permute.xlu1 %v1039_v5  ;;  %841 = vmatprep.mubr.msk.f32.mxu1 %vm1037_vm0, %v1038_v4  ;;  %v370_v12 = vld [vmem:[%s1310_s3 + $0x8] sm:$0xff]  ;;  %v366_v13 = vld [vmem:[#allocation3] sm:$0xff]  ;;  %v487_v14 = vld [vmem:[%s1311_s4] sm:$0xff]  ;;  %p803_p11 = scmp.ge.s32.totalorder %s1022_s23, 0 }
  0x5d   : > { %s858_s7 = smul.u32 24, %s344_s21  ;;  %852 = vmatpush3.bf16.msra.mxu0 %v851_v8  ;;  %374 = vperm.xlu0 %926, %v369_v9   ;;  %v488_v15 = vld [vmem:[%s1311_s4 + $0x8] sm:$0xff]  ;;  %v489_v17 = vld [vmem:[%s1311_s4 + $0x10] sm:$0xf]  ;;  %v368_v18 = vld [vmem:[#allocation3 + $0x10] sm:$0xf] }
  0x5e   : > { %824 = vmatprep.subr.mxu0 %v1038_v4  ;;  %384 = vperm.xlu1 %927, %v371_v10   ;;  %v484_v35 = vld [vmem:[#allocation5] sm:$0xff]  ;;  %v485_v36 = vld [vmem:[#allocation5 + $0x8] sm:$0xff]  ;;  %v486_v37 = vld [vmem:[#allocation5 + $0x10] sm:$0xf] }
  0x5f   : > { %s1207_s28 = scalar_lea.vmem %s1312_s5, %s858_s7  ;;  %s1212_s15 = scalar_lea.vmem %s1313_s6, %s858_s7 }
  0x60   : > { %357 = vst [vmem:[%s1207_s28] sm:$0xff] %v1038_v4  ;;  %358 = vst [vmem:[%s1207_s28 + $0x8] sm:$0xff] %v1038_v4 }
  0x61   : > { %359 = vst [vmem:[%s1207_s28 + $0x10] sm:$0xf] %v1038_v4  ;;  %360 = vst [vmem:[%s1212_s15] sm:$0xff] %v1038_v4  ;;  %825 = vmatpush3.msk.msra.mxu0 %vm397_vm1, %v365_v11  ;;  %379 = vperm.xlu0 %926, %v370_v12  }
  0x62   : > { %361 = vst [vmem:[%s1212_s15 + $0x8] sm:$0xff] %v1038_v4  ;;  %362 = vst [vmem:[%s1212_s15 + $0x10] sm:$0xf] %v1038_v4  ;;  %827 = vmatmul.mubr.msk.f32.vlgmr.msra.gmra.mrb[0].mxu0 %vm387_vm2, %v366_v13  ;;  %492 = vperm.xlu1 %927, %v487_v14  }
  0x63   : > { %829 = vmatprep.mubr.msk.f32.mxu0 %vm1037_vm0, %v1038_v4 }
  0x65   : > { %497 = vperm.xlu0 %926, %v488_v15  }
  0x66   : > { %830 = vmatmul.mubr.msk.f32.gmra.mrb[2].mxu0 %vm387_vm2, %v367_v16  ;;  %502 = vperm.xlu1 %927, %v489_v17  }
  0x67   : > { %832 = vmatprep.mubr.msk.f32.mxu0 %vm1037_vm0, %v1038_v4  ;;  %v606_v50 = vld [vmem:[%s1207_s28] sm:$0xff] (!%p803_p11)  ;;  %v607_v51 = vld [vmem:[%s1207_s28 + $0x8] sm:$0xff] (!%p803_p11) }
  0x68   : > { %v608_v52 = vld [vmem:[%s1207_s28 + $0x10] sm:$0xf] (!%p803_p11)  ;;  %v615_v57 = vld [vmem:[%s1212_s15] sm:$0xff] (!%p803_p11) }
  0x69   : > { %v616_v59 = vld [vmem:[%s1212_s15 + $0x8] sm:$0xff] (!%p803_p11)  ;;  %v617_v60 = vld [vmem:[%s1212_s15 + $0x10] sm:$0xf] (!%p803_p11) }
  0x6a   : > { %833 = vmatmul.mubr.msk.f32.gmra.mrb[4].mxu0 %vm387_vm2, %v368_v18 }
  0xdc   : > { %v375_v19 = vpop.permute.xlu0 %374 }
  0xdd   : > { %v385_v29 = vpop.permute.xlu1 %384 }
  0xe0   : > { %v380_v23 = vpop.permute.xlu0 %379 }
  0xe1   : > { %v493_v38 = vpop.permute.xlu1 %492 }
  0xe4   : > { %v498_v42 = vpop.permute.xlu0 %497 }
  0xe5   : > { %v503_v46 = vpop.permute.xlu1 %502 }
 0x135   : > { %v467_v20 = vpop.f32.mrb[0].mxu0 }
 0x136   : > { %v828_v21 = vpop.f32.mrb[1].mxu0  ;;  %v468_v22 = vadd.f32 %v467_v20, %v375_v19 }
 0x138   : > { %v481_v27 = vmax.f32 %v468_v22, 0.0 }
 0x139   : > { %v472_v24 = vpop.f32.mrb[2].mxu0 }
 0x13a   : > { %v473_v25 = vadd.f32 %v472_v24, %v380_v23  ;;  %v831_v26 = vpop.f32.mrb[3].mxu0 }
 0x13c   : > { %v482_v28 = vmax.f32 %v473_v25, 0.0 }
 0x13d   : > { %v477_v30 = vpop.f32.mrb[4].mxu0 }
 0x13e   : > { %v478_v31 = vadd.f32 %v477_v30, %v385_v29  ;;  %v834_v32 = vpop.f32.mrb[5].mxu0  ;;  %v854_v33 = vpack.c.bf16 %v482_v28, %v481_v27 }
 0x140   : > { %v483_v34 = vmax.f32 %v478_v31, 0.0  ;;  %855 = vmatpush3.bf16.msra.mxu1 %v854_v33 }
 0x141   : > { %839 = vmatprep.subr.mxu1 %v1038_v4 }
 0x144   : > { %840 = vmatpush3.msk.msra.mxu1 %vm397_vm1, %v483_v34 }
 0x145   : > { %842 = vmatmul.mubr.msk.f32.vlgmr.msra.gmra.mrb[0].mxu1 %vm387_vm2, %v484_v35 }
 0x146   : > { %844 = vmatprep.mubr.msk.f32.mxu1 %vm1037_vm0, %v1038_v4 }
 0x149   : > { %845 = vmatmul.mubr.msk.f32.gmra.mrb[2].mxu1 %vm387_vm2, %v485_v36 }
 0x14a   : > { %847 = vmatprep.mubr.msk.f32.mxu1 %vm1037_vm0, %v1038_v4 }
 0x14d   : > { %848 = vmatmul.mubr.msk.f32.gmra.mrb[4].mxu1 %vm387_vm2, %v486_v37 }
 0x218   : > { %v583_v39 = vpop.f32.mrb[0].mxu1 }
 0x219   : > { %v584_v40 = vadd.f32 %v583_v39, %v493_v38  ;;  %v843_v41 = vpop.f32.mrb[1].mxu1 }
 0x21b   : > { %602 = sbr.rel (%p803_p11) target bundleno = 552 (0x228), region = 94  ;;  %v603_v53 = vand.u32 (!%p803_p11), 2147483647, %v584_v40  ;;  %v609_v54 = vadd.f32 (!%p803_p11), %v606_v50, %v584_v40 }
 0x21c   : > { %v588_v43 = vpop.f32.mrb[2].mxu1 }
 0x21d   : > { %v589_v44 = vadd.f32 %v588_v43, %v498_v42  ;;  %v846_v45 = vpop.f32.mrb[3].mxu1  ;;  %v618_v61 = vadd.f32 (!%p803_p11), %v615_v57, %v603_v53  ;;  %612 = vst [vmem:[%s1207_s28] sm:$0xff] (!%p803_p11), %v609_v54 }
 0x21f   : > { %v610_v55 = vadd.f32 (!%p803_p11), %v607_v51, %v589_v44  ;;  %v604_v58 = vand.u32 (!%p803_p11), 2147483647, %v589_v44  ;;  %621 = vst [vmem:[%s1212_s15] sm:$0xff] (!%p803_p11), %v618_v61 }
 0x220   : > { %v593_v47 = vpop.f32.mrb[4].mxu1 }
 0x221   : > { %v594_v48 = vadd.f32 %v593_v47, %v503_v46  ;;  %v849_v49 = vpop.f32.mrb[5].mxu1  ;;  %613 = vst [vmem:[%s1207_s28 + $0x8] sm:$0xff] (!%p803_p11), %v610_v55  ;;  %v619_v63 = vadd.f32 (!%p803_p11), %v616_v59, %v604_v58 }
 0x223   : > { %v611_v56 = vadd.f32 %v608_v52, %v594_v48  ;;  %v605_v62 = vand.u32 2147483647, %v594_v48  ;;  %622 = vst [vmem:[%s1212_s15 + $0x8] sm:$0xff] %v619_v63 }
 0x225   : > { %614 = vst [vmem:[%s1207_s28 + $0x10] sm:$0xf] %v611_v56  ;;  %v620_v0 = vadd.f32 %v617_v60, %v605_v62 }
 0x227   : > { %623 = vst [vmem:[%s1212_s15 + $0x10] sm:$0xf] %v620_v0 }
 0x228 PF: > { %p804_p13 = scmp.lt.s32.totalorder %s1022_s23, 0 }
 0x229   : > { %s805_s8 = sshll.u32 (!%p804_p13), %s1022_s23, 7  ;;  %v628_v1 = vlaneseq (!%p804_p13) }
 0x22a   : > { %626 = sbr.rel (%p804_p13) target bundleno = 567 (0x237), region = 98  ;;  %v630_v2 = vstv (!%p804_p13), %s805_s8  ;;  %v639_v5 = vld [vmem:[%s1207_s28] sm:$0xff] (!%p804_p13)  ;;  %v649_v16 = vld [vmem:[%s1212_s15 + $0x8] sm:$0xff] (!%p804_p13) }
 0x22b   : > { %v629_v3 = vand.u32 (!%p804_p13), 127, %v628_v1 }
 0x22c   : > { %v641_v7 = vld [vmem:[%s1207_s28 + $0x10] sm:$0xf] (!%p804_p13)  ;;  %v648_v11 = vld [vmem:[%s1212_s15] sm:$0xff] (!%p804_p13) }
 0x22d   : > { %v631_v4 = vadd.s32 (!%p804_p13), %v630_v2, %v629_v3 }
 0x22e   : > { %v640_v6 = vld [vmem:[%s1207_s28 + $0x8] sm:$0xff] (!%p804_p13)  ;;  %v650_v17 = vld [vmem:[%s1212_s15 + $0x10] sm:$0xf] (!%p804_p13) }
 0x22f   : > { %vm632_vm3 = vcmp.lt.s32.totalorder (!%p804_p13), %v631_v4, 2 }
 0x230   : > { %v633_v8 = vsel (!%p804_p13), %vm632_vm3, %v584_v40, 0.0  ;;  %v634_v9 = vsel (!%p804_p13), %vm632_vm3, %v589_v44, 0.0  ;;  %v635_v10 = vsel (!%p804_p13), %vm632_vm3, %v594_v48, 0.0 }
 0x231   : > { %v642_v12 = vadd.f32 %v639_v5, %v633_v8  ;;  %v643_v13 = vadd.f32 %v640_v6, %v634_v9  ;;  %v644_v14 = vadd.f32 %v641_v7, %v635_v10  ;;  %v636_v15 = vand.u32 2147483647, %v633_v8 }
 0x232   : > { %v637_v18 = vand.u32 2147483647, %v634_v9  ;;  %v638_v19 = vand.u32 2147483647, %v635_v10 }
 0x233   : > { %645 = vst [vmem:[%s1207_s28] sm:$0xff] %v642_v12  ;;  %646 = vst [vmem:[%s1207_s28 + $0x8] sm:$0xff] %v643_v13  ;;  %v651_v20 = vadd.f32 %v648_v11, %v636_v15 }
 0x234   : > { %647 = vst [vmem:[%s1207_s28 + $0x10] sm:$0xf] %v644_v14  ;;  %v652_v21 = vadd.f32 %v649_v16, %v637_v18  ;;  %v653_v22 = vadd.f32 %v650_v17, %v638_v19 }
 0x235   : > { %654 = vst [vmem:[%s1212_s15] sm:$0xff] %v651_v20 }
 0x236   : > { %655 = vst [vmem:[%s1212_s15 + $0x8] sm:$0xff] %v652_v21  ;;  %656 = vst [vmem:[%s1212_s15 + $0x10] sm:$0xf] %v653_v22 }
 0x237 PF: > { %s19_s25 = sadd.s32 1, %s1030_s25   ;;  %s1324_s21 = smov %s1018_s22 }
 0x238   : > { %p16_p0 = scmp.ge.s32.totalorder %s19_s25, 4   ;;  %s1325_s22 = smov %s1125_s9 }
 0x239   : > { %s1326_s23 = smov %s1026_s24  ;;  %s1327_s24 = smov %s1329_s27 }
 0x23a   :  { %18 = sbr.rel (!%p16_p0) target bundleno = 4 (0x4), region = 146 }
 0x241   :  { %694 = vsyncpa [#allocation4], 1 }
 0x242   :  { %696 = vsyncpa [#allocation4 + $0x1], 1 }
 0x243   :  { %697 = vsyncpa [#allocation6], 1 }

</bundles_post_ra>
